<compile_context>
chip_gen: v5e
topology: v5e:2x2
jax: 0.10.0
libtpu: 0.0.40
codegen_flags: <defaults>
</compile_context>

<pallas_src>
import jax
import jax.numpy as jnp
from jax.experimental import pallas as pl
from jax.experimental.pallas import tpu as pltpu


def nsp_kernel(x_ref, w_ref, b_ref, o_ref):
    # x_ref: (TILE_B, H) VMEM   w_ref: (H, 2) VMEM (resident)   b_ref: (2,) SMEM
    x = x_ref[...]
    w = w_ref[...]
    acc = jnp.dot(x, w, preferred_element_type=jnp.float32)     # MXU, f32 accumulate
    # Bias comes from SMEM as two scalars; build the (TILE_B, 2) broadcast in-vreg.
    col = jax.lax.broadcasted_iota(jnp.int32, acc.shape, 1)
    bias = jnp.where(col == 0, b_ref[0], b_ref[1])
    o_ref[...] = (acc + bias).astype(o_ref.dtype)


def _round_up(n, m):
    return ((n + m - 1) // m) * m


def _choose_tile_b(batch, hidden, itemsize):
    # Target ~8 MiB per X buffer (x2 for double buffering) -> safe on v7x (64 MiB VMEM,
    # 32 MiB scoped default) and near HBM roofline on v5e/v6e per the tile-size sweep.
    target_bytes = 8 * 1024 * 1024
    rows = max(8, target_bytes // max(hidden * itemsize, 1))
    rows = min(rows, 2048)                      # hard cap, v7x-friendly at H=768 f32
    rows = min(rows, _round_up(batch, 8))       # never bigger than (padded) batch
    return max(8, (rows // 8) * 8)              # sublane-aligned


def next_sentence_pred(x, w_t, b, *, tile_b=None):
    """x: (B, H) f32/bf16, w_t: (H, 2) (transposed torch weight), b: (2,) -> (B, 2)."""
    B, H = x.shape
    assert w_t.shape == (H, 2)

    if tile_b is None:
        tile_b = _choose_tile_b(B, H, x.dtype.itemsize)

    # Pad batch up to a multiple of the tile; padded rows are sliced off below.
    Bp = _round_up(B, tile_b)
    xp = jnp.pad(x, ((0, Bp - B), (0, 0))) if Bp != B else x

    out = pl.pallas_call(
        nsp_kernel,
        out_shape=jax.ShapeDtypeStruct((Bp, 2), x.dtype),
        grid=(pl.cdiv(Bp, tile_b),),
        in_specs=[
            # X: tiled over batch -> double-buffered, overlaps DMA with compute.
            pl.BlockSpec((tile_b, H), lambda i: (i, 0)),
            # W: constant block index -> DMA'd once, stays resident in VMEM.
            pl.BlockSpec((H, 2), lambda i: (0, 0)),
            # bias: two scalars in SMEM, no padded VMEM tile, no per-step DMA.
            pl.BlockSpec(memory_space=pltpu.MemorySpace.SMEM),
        ],
        out_specs=pl.BlockSpec((tile_b, 2), lambda i: (i, 0)),
        compiler_params=pltpu.CompilerParams(
            # Batch axis is independent -> lets v7x shard it across its 2 TensorCores.
            dimension_semantics=("parallel",),
        ),
    )(xp, w_t, b.astype(jnp.float32))

    return out[:B] if Bp != B else out


# TODO(synk): for production BERT, fuse this 2-wide head into the preceding pooler/dense
# kernel (one extra jnp.dot on an already-resident tile) to avoid an HBM round-trip of X.


if __name__ == "__main__":
    key = jax.random.PRNGKey(0)
    k_x, k_w, k_b, k_x2 = jax.random.split(key, 4)

    # Small shapes consistent with the module's forward: X is (batch, num_inputs).
    batch, num_inputs = 8, 32
    bound = 1.0 / jnp.sqrt(num_inputs)
    w = jax.random.uniform(k_w, (2, num_inputs), jnp.float32, -bound, bound)  # torch (out, in)
    b = jax.random.uniform(k_b, (2,), jnp.float32, -bound, bound)
    x = jax.random.normal(k_x, (batch, num_inputs), jnp.float32)

    out = jax.block_until_ready(next_sentence_pred(x, w.T, b))
    ref = x @ w.T + b
    assert out.shape == (batch, 2)
    assert jnp.allclose(out, ref, atol=1e-5, rtol=1e-5), "f32 mismatch vs reference"

    # Exercise the multi-block pipelined path + non-divisible batch padding.
    B2, H2 = 200, 128
    bound2 = 1.0 / jnp.sqrt(H2)
    w2 = jax.random.uniform(k_w, (2, H2), jnp.float32, -bound2, bound2)
    b2 = jax.random.uniform(k_b, (2,), jnp.float32, -bound2, bound2)
    x2 = jax.random.normal(k_x2, (B2, H2), jnp.float32)
    out2 = jax.block_until_ready(next_sentence_pred(x2, w2.T, b2, tile_b=64))
    ref2 = x2 @ w2.T + b2
    assert out2.shape == (B2, 2)
    assert jnp.allclose(out2, ref2, atol=1e-4, rtol=1e-4), "tiled f32 mismatch vs reference"

    # bf16 inputs (typical encoder output dtype): halves HBM traffic, f32 accumulation.
    out_bf = jax.block_until_ready(
        next_sentence_pred(x.astype(jnp.bfloat16), w.T.astype(jnp.bfloat16), b)
    )
    assert out_bf.shape == (batch, 2)
    assert jnp.allclose(out_bf.astype(jnp.float32), ref, atol=1e-1, rtol=1e-1), "bf16 mismatch"

    print("KERNEL_OK")
</pallas_src>

<mosaic_0001>
module attributes {stable_mosaic.version = 11 : i64} {
  func.func @nsp_kernel(%arg0: i32, %arg1: memref<8x32xf32, #tpu.memory_space<vmem>>, %arg2: memref<32x2xf32, #tpu.memory_space<vmem>>, %arg3: memref<2xf32, #tpu.memory_space<smem>>, %arg4: memref<8x2xf32, #tpu.memory_space<vmem>>) attributes {dimension_semantics = [#tpu.dimension_semantics<parallel>], iteration_bounds = array<i64: 1>, scalar_prefetch = 0 : i64, scratch_operands = 0 : i64, tpu.core_type = #tpu.core_type<tc>, window_params = [{transform_indices = @transform_0, window_bounds = array<i64: 8, 32>}, {pipeline_mode = #tpu.pipeline_mode<synchronous>, transform_indices = @transform_1, window_bounds = array<i64: 32, 2>}, {transform_indices = @transform_2, window_bounds = array<i64: 2>}, {transform_indices = @transform_3, window_bounds = array<i64: 8, 2>}]} {
    %c0 = arith.constant 0 : index
    %c0_0 = arith.constant 0 : index
    %0 = vector.load %arg1[%c0, %c0_0] : memref<8x32xf32, #tpu.memory_space<vmem>>, vector<8x32xf32>
    %c0_1 = arith.constant 0 : index
    %c0_2 = arith.constant 0 : index
    %1 = vector.load %arg2[%c0_1, %c0_2] : memref<32x2xf32, #tpu.memory_space<vmem>>, vector<32x2xf32>
    %cst = arith.constant dense<0.000000e+00> : vector<8x2xf32>
    %2 = tpu.matmul %0, %1, %cst {dimension_numbers = #tpu.dot_dimension_numbers<[1], [0], [0], [1], [0, 0, 1, 1], [], []>} : vector<8x32xf32>, vector<32x2xf32>, vector<8x2xf32> -> vector<8x2xf32>
    %3 = tpu.iota {dimensions = array<i32: 1>} : vector<8x2xi32>
    %c0_i32 = arith.constant 0 : i32
    %4 = vector.broadcast %c0_i32 : i32 to vector<8x2xi32>
    %5 = arith.cmpi eq, %3, %4 : vector<8x2xi32>
    %c0_3 = arith.constant 0 : index
    %6 = memref.load %arg3[%c0_3] : memref<2xf32, #tpu.memory_space<smem>>
    %c1 = arith.constant 1 : index
    %7 = memref.load %arg3[%c1] : memref<2xf32, #tpu.memory_space<smem>>
    %8 = vector.broadcast %6 : f32 to vector<8x2xf32>
    %9 = vector.broadcast %7 : f32 to vector<8x2xf32>
    %10 = arith.select %5, %8, %9 : vector<8x2xi1>, vector<8x2xf32>
    %11 = arith.addf %2, %10 : vector<8x2xf32>
    %c0_4 = arith.constant 0 : index
    %c0_5 = arith.constant 0 : index
    %12 = vector.load %arg4[%c0_4, %c0_5] : memref<8x2xf32, #tpu.memory_space<vmem>>, vector<8x2xf32>
    tpu.vector_store %arg4[%c0_4, %c0_5], %11 {strides = array<i32>} : memref<8x2xf32, #tpu.memory_space<vmem>>, vector<8x2xf32>,
    return
  }
  func.func @transform_0(%arg0: i32) -> (i32, i32) {
    %c0_i32 = arith.constant 0 : i32
    %c0_i32_0 = arith.constant 0 : i32
    return %arg0, %c0_i32 : i32, i32
  }
  func.func @transform_1(%arg0: i32) -> (i32, i32) {
    %c0_i32 = arith.constant 0 : i32
    %c0_i32_0 = arith.constant 0 : i32
    %c0_i32_1 = arith.constant 0 : i32
    return %c0_i32, %c0_i32_0 : i32, i32
  }
  func.func @transform_2(%arg0: i32) -> i32 {
    %c0_i32 = arith.constant 0 : i32
    %c0_i32_0 = arith.constant 0 : i32
    return %c0_i32 : i32
  }
  func.func @transform_3(%arg0: i32) -> (i32, i32) {
    %c0_i32 = arith.constant 0 : i32
    %c0_i32_0 = arith.constant 0 : i32
    return %arg0, %c0_i32 : i32, i32
  }
}

</mosaic_0001>

<bundles_post_ra>
// kernel: tpu_custom_call.1
= control target key start
LH: loop header
LB: loop body
LE: loop exit
PB: predicated region body
PF: predicated region fallthrough
CT: control target
= control target key end

     0   :  { %8 = vsyncpa [#allocation3], 0  ;;  %s88_s15 = smov [#allocation2]   ;;  %s130_s0 = inlined_call_operand.vmem [shape: f32[8,32], index: 0, kind: input, shape index: {}]   ;;  %s131_s1 = inlined_call_operand.vmem [shape: f32[32,2], index: 1, kind: input, shape index: {}]   ;;  %s132_s2 = inlined_call_operand.vmem [shape: f32[2], index: 2, kind: input, shape index: {}]   ;;  %s133_s3 = inlined_call_operand.vmem [shape: f32[8,2], index: 3, kind: output, shape index: {}]  }
   0x1   :  { %s18_s14 = sshll.u32 %s132_s2, 4  ;;  %s19_s14 = int_to_ptr.vmem [resolvable:$true] %s18_s14 }
   0x2   :  { %21 = dma.vmem_to_smem %s19_s14, 16, %s88_s15, [#allocation3]  }
   0x3   :  { %86 = dma.done.wait [#allocation3], 16  }
   0x4   :  { %87 = vsyncadd [#allocation3], 4294967280 }
   0x5   :  { %26 = sfence }
   0x6   :  { %v31_v0 = vld [vmem:[%s131_s1 + $0x18] sm:$0xff]  ;;  %v30_v1 = vld [vmem:[%s131_s1 + $0x10] sm:$0xff]  ;;  %v29_v2 = vld [vmem:[%s131_s1 + $0x8] sm:$0xff]  ;;  %vm40_vm0 = vcmask 261120   ;;  %s35_s25 = sld [smem:[#allocation2]]  ;;  %v32_v5 = vlaneseq  ;;  %vm64_vm2 = vcmask 15360  }
   0x7   :  { %56 = vmatpush.msra.mxu0 %v31_v0  ;;  %v28_v3 = vld [vmem:[%s131_s1] sm:$0xff]  ;;  %s71_s26 = sld [smem:[#allocation2 + $0x1]] }
   0x8   :  { %v27_v4 = vld [vmem:[%s130_s0] sm:$0xff]  ;;  %v33_v6 = vand.u32 127, %v32_v5 }
   0x9   :  { %57 = vmatpush.msra.mxu0 %v30_v1 }
   0xa   :  { %vm34_vm1 = vcmp.eq.s32.totalorder %v33_v6, 0 }
   0xb   :  { %58 = vmatpush.msra.mxu0 %v29_v2 }
   0xc   :  { %v37_v7 = vstv %s35_s25 }
   0xd   :  { %59 = vmatpush.msra.mxu0 %v28_v3  ;;  %v38_v8 = vstv %s71_s26 }
   0xe   :  { %72 = vmatmul.msk.f32.vlgmr.msra.gmra.mxu0 %vm40_vm0, %v27_v4  ;;  %v39_v9 = vsel %vm34_vm1, %v37_v7, %v38_v8 }
  0x8b   :  { %v61_v10 = vpop.f32.mrf.mxu0 }
  0x8c   :  { %v62_v11 = vadd.f32 %v61_v10, %v39_v9 }
  0x8e   :  { %65 = vst.msk [vmem:[%s133_s3] sm:$0xff] %vm64_vm2, %v62_v11 }
  0x8f   :  { %70 = vsyncpa [#allocation3], 1 }

</bundles_post_ra>
